<compile_context>
chip_gen: v7x
topology: tpu7x:2x2x1
jax: 0.10.0
libtpu: 0.0.40
codegen_flags: <defaults>
</compile_context>

<pallas_src>
import functools
import math

import jax
import jax.numpy as jnp
from jax.experimental import pallas as pl
from jax.experimental.pallas import tpu as pltpu

_BN_EPS = 1e-5              # torch.nn.BatchNorm1d default eps
_LANE = 128
_VMEM_TARGET = 40 * 1024 * 1024   # keep working set well under v7x's 64 MiB/TC
_VMEM_CEIL = 56 * 1024 * 1024


def _round_up(n, m):
    return ((n + m - 1) // m) * m


# --------------------------------------------------------------------------- #
# Kernel
# --------------------------------------------------------------------------- #
def _mlp_kernel(x_ref,
                w1_ref, b1_ref,
                w2_ref, b2_ref,
                w3_ref, b3_ref,
                w4_ref, b4_ref,
                out_ref, *, matmul_dtype):
    # Block 1: Linear -> ReLU   (BN1 already folded into W2/b2).
    # x arrives f32; cast to the MXU dtype in VMEM (hidden under MXU work).
    h = jnp.dot(x_ref[...].astype(matmul_dtype), w1_ref[...],
                preferred_element_type=jnp.float32) + b1_ref[...]
    h = jnp.maximum(h, 0.0)

    # Block 2: Linear -> ReLU   (BN2 already folded into W3/b3).
    h = jnp.dot(h.astype(matmul_dtype), w2_ref[...],
                preferred_element_type=jnp.float32) + b2_ref[...]
    h = jnp.maximum(h, 0.0)

    # Block 3: Linear -> ReLU.
    h = jnp.dot(h.astype(matmul_dtype), w3_ref[...],
                preferred_element_type=jnp.float32) + b3_ref[...]
    h = jnp.maximum(h, 0.0)

    # Head Linear(H//2, 1): VPU multiply + XLU lane reduction instead of a
    # degenerate 1-column MXU matmul; compact (TM, 1) store (4 B/row).
    out_ref[...] = (jnp.sum(h * w4_ref[...], axis=-1, keepdims=True)
                    + b4_ref[...])


# --------------------------------------------------------------------------- #
# Glue: fold eval-mode BatchNorm into the next Linear, pad hidden dims.
# --------------------------------------------------------------------------- #
def _prepare_params(params, *, matmul_dtype=jnp.bfloat16, bn_eps=_BN_EPS,
                    lane_pad=_LANE):
    w1, b1 = params["w1"], params["b1"]
    w2, b2 = params["w2"], params["b2"]
    w3, b3 = params["w3"], params["b3"]
    w4, b4 = params["w4"], params["b4"]

    # Eval-mode BatchNorm1d -> per-feature scale/shift.
    s1 = params["bn1_gamma"] * jax.lax.rsqrt(params["bn1_var"] + bn_eps)
    t1 = params["bn1_beta"] - params["bn1_mean"] * s1
    s2 = params["bn2_gamma"] * jax.lax.rsqrt(params["bn2_var"] + bn_eps)
    t2 = params["bn2_beta"] - params["bn2_mean"] * s2

    # Fold:  (h*s + t) @ W + b  ==  h @ (s[:, None] * W) + (t @ W + b)
    b2 = b2 + t1[None, :] @ w2
    w2 = s1[:, None] * w2
    b3 = b3 + t2[None, :] @ w3
    w3 = s2[:, None] * w3

    # Zero-pad hidden dims to lane multiples (exact: padded activations are
    # relu(0 + 0) = 0 and hit zero weight rows / zero head lanes).
    d1 = _round_up(w1.shape[1], lane_pad)
    d2 = _round_up(w2.shape[1], lane_pad)
    d3 = _round_up(w3.shape[1], lane_pad)

    w1 = jnp.pad(w1, ((0, 0), (0, d1 - w1.shape[1])))
    b1 = jnp.pad(b1, ((0, 0), (0, d1 - b1.shape[1])))
    w2 = jnp.pad(w2, ((0, d1 - w2.shape[0]), (0, d2 - w2.shape[1])))
    b2 = jnp.pad(b2, ((0, 0), (0, d2 - b2.shape[1])))
    w3 = jnp.pad(w3, ((0, d2 - w3.shape[0]), (0, d3 - w3.shape[1])))
    b3 = jnp.pad(b3, ((0, 0), (0, d3 - b3.shape[1])))
    w4_row = jnp.pad(w4.T, ((0, 0), (0, d3 - w4.shape[0])))  # [1, d3], f32

    return (w1.astype(matmul_dtype), b1.astype(jnp.float32),
            w2.astype(matmul_dtype), b2.astype(jnp.float32),
            w3.astype(matmul_dtype), b3.astype(jnp.float32),
            w4_row.astype(jnp.float32), b4.astype(jnp.float32))


def _vmem_estimate(tm, emb, d1, d2, d3, mm_bytes, x_buffers):
    """Conservative VMEM working-set estimate in bytes."""
    x_bytes = x_buffers * tm * emb * 4                       # f32 x tiles
    w_bytes = (emb * d1 + d1 * d2 + d2 * d3) * mm_bytes + d3 * 4
    b_bytes = (d1 + d2 + d3 + 1) * 4
    out_bytes = 2 * tm * 4
    act_bytes = tm * (emb + 2 * d1 + 2 * d2 + 2 * d3) * 4    # f32 h + casts
    return x_bytes + w_bytes + b_bytes + out_bytes + act_bytes


# --------------------------------------------------------------------------- #
# Wrapper
# --------------------------------------------------------------------------- #
def verbalizer_classifier_forward(x, params, *, matmul_dtype=jnp.bfloat16,
                                  tm=512):
    """Full classifier MLP in a single batch-tiled Pallas kernel.

    x: [batch, embedding_dim] float32 embeddings.
    Returns (logits [batch, 1], None), mirroring the PyTorch forward.
    """
    batch, emb = x.shape
    w1, b1, w2, b2, w3, b3, w4_row, b4 = _prepare_params(
        params, matmul_dtype=matmul_dtype)
    d1, d2, d3 = w1.shape[1], w2.shape[1], w3.shape[1]
    mm_bytes = jnp.dtype(matmul_dtype).itemsize

    # Pad the batch only to the next multiple of 128 (not of tm).
    padded_batch = _round_up(batch, _LANE)
    xp = x.astype(jnp.float32)
    if padded_batch != batch:
        xp = jnp.pad(xp, ((0, padded_batch - batch), (0, 0)))

    # Deeper x pipeline when E is small (x DMA otherwise exposed between
    # short matmuls); default depth 2 when the MXU dominates.
    x_buffers = 3 if emb < 256 else 2

    # Shrink the batch tile until the VMEM working set fits the budget.
    tm_cap = max(_LANE, (min(tm, padded_batch) // _LANE) * _LANE)
    while (tm_cap > _LANE and
           _vmem_estimate(tm_cap, emb, d1, d2, d3, mm_bytes, x_buffers)
           > _VMEM_TARGET):
        tm_cap -= _LANE

    # Pick tm as a divisor of the 128-padded batch; keep >=2 grid steps when
    # possible so dimension_semantics=("parallel",) shards both v7x TCs.
    nblocks = padded_batch // _LANE
    cap_blocks = tm_cap // _LANE
    if nblocks >= 2:
        cap_blocks = min(cap_blocks, max(nblocks // 2, 1))
    blocks_per_tile = 1
    for d in range(min(cap_blocks, nblocks), 0, -1):
        if nblocks % d == 0:
            blocks_per_tile = d
            break
    tm = blocks_per_tile * _LANE
    grid = (nblocks // blocks_per_tile,)

    est = _vmem_estimate(tm, emb, d1, d2, d3, mm_bytes, x_buffers)
    vmem_limit = int(min(max(1.5 * est + (4 << 20), 32 << 20), _VMEM_CEIL))

    flops = 2 * padded_batch * (emb * d1 + d1 * d2 + d2 * d3 + d3)
    bytes_accessed = (padded_batch * emb * 4
                      + (emb * d1 + d1 * d2 + d2 * d3) * mm_bytes
                      + (d1 + d2 + 2 * d3 + 1) * 4
                      + padded_batch * 4)

    weights = (w1, b1, w2, b2, w3, b3, w4_row, b4)

    def build(use_pipeline_modes):
        def param_spec(arr):
            # Full-array block, constant index_map -> DMA'd once, VMEM-resident.
            if use_pipeline_modes:
                # Single-buffer the resident parameters (halves weight VMEM).
                return pl.BlockSpec(arr.shape, lambda i: (0, 0),
                                    pipeline_mode=pl.Buffered(1))
            return pl.BlockSpec(arr.shape, lambda i: (0, 0))

        if use_pipeline_modes:
            x_spec = pl.BlockSpec((tm, emb), lambda i: (i, 0),
                                  pipeline_mode=pl.Buffered(x_buffers))
        else:
            x_spec = pl.BlockSpec((tm, emb), lambda i: (i, 0))

        return pl.pallas_call(
            functools.partial(_mlp_kernel, matmul_dtype=matmul_dtype),
            grid=grid,
            in_specs=[x_spec] + [param_spec(w) for w in weights],
            out_specs=pl.BlockSpec((tm, 1), lambda i: (i, 0)),
            out_shape=jax.ShapeDtypeStruct((padded_batch, 1), jnp.float32),
            compiler_params=pltpu.CompilerParams(
                dimension_semantics=("parallel",),
                vmem_limit_bytes=vmem_limit),
            cost_estimate=pl.CostEstimate(
                flops=flops, transcendentals=0,
                bytes_accessed=bytes_accessed),
        )

    try:
        out = build(True)(xp, *weights)
    except Exception:
        # Fallback for jax versions without BlockSpec(pipeline_mode=...):
        # identical semantics, default double-buffered specs.
        out = build(False)(xp, *weights)

    return out[:batch], None


# --------------------------------------------------------------------------- #
# Parameter init mirroring the PyTorch module (_init_weights + BN defaults)
# --------------------------------------------------------------------------- #
def _xavier_uniform(key, fan_in, fan_out):
    bound = math.sqrt(6.0 / (fan_in + fan_out))
    # Stored as [in, out]; xavier_uniform_ is symmetric under transpose.
    return jax.random.uniform(key, (fan_in, fan_out), jnp.float32, -bound, bound)


def init_params(key, embedding_dim, hidden_dim):
    dims = [embedding_dim, 2 * hidden_dim, hidden_dim, hidden_dim // 2, 1]
    keys = jax.random.split(key, 4)
    p = {}
    for i, (din, dout) in enumerate(zip(dims[:-1], dims[1:]), start=1):
        p[f"w{i}"] = _xavier_uniform(keys[i - 1], din, dout)
        p[f"b{i}"] = jnp.zeros((1, dout), jnp.float32)  # bias filled with 0

    # BatchNorm1d defaults: gamma=1, beta=0, running_mean=0, running_var=1.
    for name, d in (("bn1", 2 * hidden_dim), ("bn2", hidden_dim)):
        p[f"{name}_gamma"] = jnp.ones((d,), jnp.float32)
        p[f"{name}_beta"] = jnp.zeros((d,), jnp.float32)
        p[f"{name}_mean"] = jnp.zeros((d,), jnp.float32)
        p[f"{name}_var"] = jnp.ones((d,), jnp.float32)
    return p


# --------------------------------------------------------------------------- #
# Pure-JAX reference (eval-mode semantics of the PyTorch module)
# --------------------------------------------------------------------------- #
def _reference_forward(x, params, bn_eps=_BN_EPS):
    h = jnp.maximum(x @ params["w1"] + params["b1"], 0.0)
    h = ((h - params["bn1_mean"])
         * (params["bn1_gamma"] / jnp.sqrt(params["bn1_var"] + bn_eps))
         + params["bn1_beta"])
    h = jnp.maximum(h @ params["w2"] + params["b2"], 0.0)
    h = ((h - params["bn2_mean"])
         * (params["bn2_gamma"] / jnp.sqrt(params["bn2_var"] + bn_eps))
         + params["bn2_beta"])
    h = jnp.maximum(h @ params["w3"] + params["b3"], 0.0)
    return h @ params["w4"] + params["b4"]


if __name__ == "__main__":
    # Small, module-consistent shapes: embeddings [batch, embedding_dim].
    batch, embedding_dim, hidden_dim = 8, 64, 16

    key = jax.random.PRNGKey(0)
    keys = jax.random.split(key, 12)
    x = jax.random.normal(keys[0], (batch, embedding_dim), jnp.float32)
    params = init_params(keys[1], embedding_dim, hidden_dim)

    # Perturb BN statistics so the BN-folding path is actually exercised.
    d1, d2 = 2 * hidden_dim, hidden_dim
    params["bn1_gamma"] = 1.0 + 0.1 * jax.random.normal(keys[2], (d1,), jnp.float32)
    params["bn1_beta"] = 0.1 * jax.random.normal(keys[3], (d1,), jnp.float32)
    params["bn1_mean"] = 0.1 * jax.random.normal(keys[4], (d1,), jnp.float32)
    params["bn1_var"] = 0.5 + jax.random.uniform(keys[5], (d1,), jnp.float32)
    params["bn2_gamma"] = 1.0 + 0.1 * jax.random.normal(keys[6], (d2,), jnp.float32)
    params["bn2_beta"] = 0.1 * jax.random.normal(keys[7], (d2,), jnp.float32)
    params["bn2_mean"] = 0.1 * jax.random.normal(keys[8], (d2,), jnp.float32)
    params["bn2_var"] = 0.5 + jax.random.uniform(keys[9], (d2,), jnp.float32)

    ref = _reference_forward(x, params)

    # f32 path: exact (BN fold + zero padding are exact algebra).
    logits_f32, aux = verbalizer_classifier_forward(
        x, params, matmul_dtype=jnp.float32)
    logits_f32 = jax.block_until_ready(logits_f32)
    assert logits_f32.shape == (batch, 1)
    assert aux is None
    assert jnp.allclose(logits_f32, ref, atol=1e-4, rtol=1e-4), (
        float(jnp.max(jnp.abs(logits_f32 - ref))))

    # Default bf16 MXU path: f32 accumulation, small drift vs f32 reference.
    logits_bf16, _ = verbalizer_classifier_forward(x, params)
    logits_bf16 = jax.block_until_ready(logits_bf16)
    assert logits_bf16.shape == (batch, 1)
    assert jnp.allclose(logits_bf16, ref, atol=5e-2, rtol=5e-2), (
        float(jnp.max(jnp.abs(logits_bf16 - ref))))

    # Non-multiple-of-128 batch exercises the 128-padding + tm-divisor path
    # (grid > 1, so the parallel batch axis is actually tiled).
    x2 = jax.random.normal(keys[10], (300, embedding_dim), jnp.float32)
    ref2 = _reference_forward(x2, params)
    logits2, _ = verbalizer_classifier_forward(x2, params)
    logits2 = jax.block_until_ready(logits2)
    assert logits2.shape == (300, 1)
    assert jnp.allclose(logits2, ref2, atol=5e-2, rtol=5e-2), (
        float(jnp.max(jnp.abs(logits2 - ref2))))

    print("KERNEL_OK")
</pallas_src>

<mosaic_0001>
module attributes {stable_mosaic.version = 11 : i64} {
  func.func @_mlp_kernel(%arg0: i32, %arg1: memref<128x64xf32, #tpu.memory_space<vmem>>, %arg2: memref<64x128xf32, #tpu.memory_space<vmem>>, %arg3: memref<1x128xf32, #tpu.memory_space<vmem>>, %arg4: memref<128x128xf32, #tpu.memory_space<vmem>>, %arg5: memref<1x128xf32, #tpu.memory_space<vmem>>, %arg6: memref<128x128xf32, #tpu.memory_space<vmem>>, %arg7: memref<1x128xf32, #tpu.memory_space<vmem>>, %arg8: memref<1x128xf32, #tpu.memory_space<vmem>>, %arg9: memref<1x1xf32, #tpu.memory_space<vmem>>, %arg10: memref<128x1xf32, #tpu.memory_space<vmem>>) attributes {dimension_semantics = [#tpu.dimension_semantics<parallel>], iteration_bounds = array<i64: 1>, scalar_prefetch = 0 : i64, scratch_operands = 0 : i64, tpu.core_type = #tpu.core_type<tc>, window_params = [{transform_indices = @transform_0, window_bounds = array<i64: 128, 64>}, {pipeline_mode = #tpu.pipeline_mode<synchronous>, transform_indices = @transform_1, window_bounds = array<i64: 64, 128>}, {pipeline_mode = #tpu.pipeline_mode<synchronous>, transform_indices = @transform_2, window_bounds = array<i64: 1, 128>}, {pipeline_mode = #tpu.pipeline_mode<synchronous>, transform_indices = @transform_3, window_bounds = array<i64: 128, 128>}, {pipeline_mode = #tpu.pipeline_mode<synchronous>, transform_indices = @transform_4, window_bounds = array<i64: 1, 128>}, {pipeline_mode = #tpu.pipeline_mode<synchronous>, transform_indices = @transform_5, window_bounds = array<i64: 128, 128>}, {pipeline_mode = #tpu.pipeline_mode<synchronous>, transform_indices = @transform_6, window_bounds = array<i64: 1, 128>}, {pipeline_mode = #tpu.pipeline_mode<synchronous>, transform_indices = @transform_7, window_bounds = array<i64: 1, 128>}, {pipeline_mode = #tpu.pipeline_mode<synchronous>, transform_indices = @transform_8, window_bounds = array<i64: 1, 1>}, {transform_indices = @transform_9, window_bounds = array<i64: 128, 1>}]} {
    %c0 = arith.constant 0 : index
    %c0_0 = arith.constant 0 : index
    %0 = vector.load %arg1[%c0, %c0_0] : memref<128x64xf32, #tpu.memory_space<vmem>>, vector<128x64xf32>
    %c0_1 = arith.constant 0 : index
    %c0_2 = arith.constant 0 : index
    %1 = vector.load %arg2[%c0_1, %c0_2] : memref<64x128xf32, #tpu.memory_space<vmem>>, vector<64x128xf32>
    %cst = arith.constant dense<0.000000e+00> : vector<128x128xf32>
    %2 = tpu.matmul %0, %1, %cst {dimension_numbers = #tpu.dot_dimension_numbers<[1], [0], [0], [1], [0, 0, 1, 1], [], []>} : vector<128x64xf32>, vector<64x128xf32>, vector<128x128xf32> -> vector<128x128xf32>
    %c0_3 = arith.constant 0 : index
    %c0_4 = arith.constant 0 : index
    %3 = vector.load %arg3[%c0_3, %c0_4] : memref<1x128xf32, #tpu.memory_space<vmem>>, vector<1x128xf32>
    %4 = vector.broadcast %3 : vector<1x128xf32> to vector<128x128xf32>
    %5 = arith.addf %2, %4 : vector<128x128xf32>
    %cst_5 = arith.constant 0.000000e+00 : f32
    %6 = vector.broadcast %cst_5 : f32 to vector<128x128xf32>
    %7 = arith.maximumf %5, %6 : vector<128x128xf32>
    %c0_6 = arith.constant 0 : index
    %c0_7 = arith.constant 0 : index
    %8 = vector.load %arg4[%c0_6, %c0_7] : memref<128x128xf32, #tpu.memory_space<vmem>>, vector<128x128xf32>
    %cst_8 = arith.constant dense<0.000000e+00> : vector<128x128xf32>
    %9 = tpu.matmul %7, %8, %cst_8 {dimension_numbers = #tpu.dot_dimension_numbers<[1], [0], [0], [1], [0, 0, 1, 1], [], []>} : vector<128x128xf32>, vector<128x128xf32>, vector<128x128xf32> -> vector<128x128xf32>
    %c0_9 = arith.constant 0 : index
    %c0_10 = arith.constant 0 : index
    %10 = vector.load %arg5[%c0_9, %c0_10] : memref<1x128xf32, #tpu.memory_space<vmem>>, vector<1x128xf32>
    %11 = vector.broadcast %10 : vector<1x128xf32> to vector<128x128xf32>
    %12 = arith.addf %9, %11 : vector<128x128xf32>
    %cst_11 = arith.constant 0.000000e+00 : f32
    %13 = vector.broadcast %cst_11 : f32 to vector<128x128xf32>
    %14 = arith.maximumf %12, %13 : vector<128x128xf32>
    %c0_12 = arith.constant 0 : index
    %c0_13 = arith.constant 0 : index
    %15 = vector.load %arg6[%c0_12, %c0_13] : memref<128x128xf32, #tpu.memory_space<vmem>>, vector<128x128xf32>
    %cst_14 = arith.constant dense<0.000000e+00> : vector<128x128xf32>
    %16 = tpu.matmul %14, %15, %cst_14 {dimension_numbers = #tpu.dot_dimension_numbers<[1], [0], [0], [1], [0, 0, 1, 1], [], []>} : vector<128x128xf32>, vector<128x128xf32>, vector<128x128xf32> -> vector<128x128xf32>
    %c0_15 = arith.constant 0 : index
    %c0_16 = arith.constant 0 : index
    %17 = vector.load %arg7[%c0_15, %c0_16] : memref<1x128xf32, #tpu.memory_space<vmem>>, vector<1x128xf32>
    %18 = vector.broadcast %17 : vector<1x128xf32> to vector<128x128xf32>
    %19 = arith.addf %16, %18 : vector<128x128xf32>
    %cst_17 = arith.constant 0.000000e+00 : f32
    %20 = vector.broadcast %cst_17 : f32 to vector<128x128xf32>
    %21 = arith.maximumf %19, %20 : vector<128x128xf32>
    %c0_18 = arith.constant 0 : index
    %c0_19 = arith.constant 0 : index
    %22 = vector.load %arg8[%c0_18, %c0_19] : memref<1x128xf32, #tpu.memory_space<vmem>>, vector<1x128xf32>
    %23 = vector.broadcast %22 : vector<1x128xf32> to vector<128x128xf32>
    %24 = arith.mulf %21, %23 : vector<128x128xf32>
    %cst_20 = arith.constant dense<0.000000e+00> : vector<128xf32>
    %25 = vector.multi_reduction <add>, %24, %cst_20 [1] : vector<128x128xf32> to vector<128xf32>
    %26 = vector.shape_cast %25 : vector<128xf32> to vector<128x1xf32>
    %c0_21 = arith.constant 0 : index
    %c0_22 = arith.constant 0 : index
    %27 = vector.load %arg9[%c0_21, %c0_22] : memref<1x1xf32, #tpu.memory_space<vmem>>, vector<1x1xf32>
    %28 = vector.broadcast %27 : vector<1x1xf32> to vector<128x1xf32>
    %29 = arith.addf %26, %28 : vector<128x1xf32>
    %c0_23 = arith.constant 0 : index
    %c0_24 = arith.constant 0 : index
    %30 = vector.load %arg10[%c0_23, %c0_24] : memref<128x1xf32, #tpu.memory_space<vmem>>, vector<128x1xf32>
    tpu.vector_store %arg10[%c0_23, %c0_24], %29 {strides = array<i32>} : memref<128x1xf32, #tpu.memory_space<vmem>>, vector<128x1xf32>,
    return
  }
  func.func @transform_0(%arg0: i32) -> (i32, i32) {
    %c0_i32 = arith.constant 0 : i32
    %c0_i32_0 = arith.constant 0 : i32
    return %arg0, %c0_i32 : i32, i32
  }
  func.func @transform_1(%arg0: i32) -> (i32, i32) {
    %c0_i32 = arith.constant 0 : i32
    %c0_i32_0 = arith.constant 0 : i32
    %c0_i32_1 = arith.constant 0 : i32
    return %c0_i32, %c0_i32_0 : i32, i32
  }
  func.func @transform_2(%arg0: i32) -> (i32, i32) {
    %c0_i32 = arith.constant 0 : i32
    %c0_i32_0 = arith.constant 0 : i32
    %c0_i32_1 = arith.constant 0 : i32
    return %c0_i32, %c0_i32_0 : i32, i32
  }
  func.func @transform_3(%arg0: i32) -> (i32, i32) {
    %c0_i32 = arith.constant 0 : i32
    %c0_i32_0 = arith.constant 0 : i32
    %c0_i32_1 = arith.constant 0 : i32
    return %c0_i32, %c0_i32_0 : i32, i32
  }
  func.func @transform_4(%arg0: i32) -> (i32, i32) {
    %c0_i32 = arith.constant 0 : i32
    %c0_i32_0 = arith.constant 0 : i32
    %c0_i32_1 = arith.constant 0 : i32
    return %c0_i32, %c0_i32_0 : i32, i32
  }
  func.func @transform_5(%arg0: i32) -> (i32, i32) {
    %c0_i32 = arith.constant 0 : i32
    %c0_i32_0 = arith.constant 0 : i32
    %c0_i32_1 = arith.constant 0 : i32
    return %c0_i32, %c0_i32_0 : i32, i32
  }
  func.func @transform_6(%arg0: i32) -> (i32, i32) {
    %c0_i32 = arith.constant 0 : i32
    %c0_i32_0 = arith.constant 0 : i32
    %c0_i32_1 = arith.constant 0 : i32
    return %c0_i32, %c0_i32_0 : i32, i32
  }
  func.func @transform_7(%arg0: i32) -> (i32, i32) {
    %c0_i32 = arith.constant 0 : i32
    %c0_i32_0 = arith.constant 0 : i32
    %c0_i32_1 = arith.constant 0 : i32
    return %c0_i32, %c0_i32_0 : i32, i32
  }
  func.func @transform_8(%arg0: i32) -> (i32, i32) {
    %c0_i32 = arith.constant 0 : i32
    %c0_i32_0 = arith.constant 0 : i32
    %c0_i32_1 = arith.constant 0 : i32
    return %c0_i32, %c0_i32_0 : i32, i32
  }
  func.func @transform_9(%arg0: i32) -> (i32, i32) {
    %c0_i32 = arith.constant 0 : i32
    %c0_i32_0 = arith.constant 0 : i32
    return %arg0, %c0_i32 : i32, i32
  }
}

</mosaic_0001>

<bundles_post_ra>
// kernel: tpu_custom_call.1
= control target key start
LH: loop header
LB: loop body
LE: loop exit
PB: predicated region body
PF: predicated region fallthrough
CT: control target
= control target key end

     0   :  { %s1499_s0 = inlined_call_operand.vmem [shape: f32[128,64], index: 0, kind: input, shape index: {}]   ;;  %s1500_s1 = inlined_call_operand.vmem [shape: f32[64,128], index: 1, kind: input, shape index: {}]   ;;  %s1501_s2 = inlined_call_operand.vmem [shape: f32[1,128], index: 2, kind: input, shape index: {}]   ;;  %s1502_s3 = inlined_call_operand.vmem [shape: f32[128,128], index: 3, kind: input, shape index: {}]   ;;  %s1503_s4 = inlined_call_operand.vmem [shape: f32[1,128], index: 4, kind: input, shape index: {}]   ;;  %s1504_s5 = inlined_call_operand.hbm [shape: f32[128,128], index: 5, kind: input, shape index: {}]   ;;  %s1505_s6 = inlined_call_operand.vmem [shape: f32[1,128], index: 6, kind: input, shape index: {}]   ;;  %s1506_s7 = inlined_call_operand.vmem [shape: f32[1,128], index: 7, kind: input, shape index: {}]   ;;  %s1507_s8 = inlined_call_operand.<no memory space> [shape: f32[1,1], index: 8, kind: input, shape index: {}]   ;;  %s1508_s9 = inlined_call_operand.vmem [shape: f32[128,1], index: 9, kind: output, shape index: {}]  }
   0x1   :  { %v14_v0 = vstv %s1507_s8 }
   0x2   :  { %15 = vst [vmem:[#allocation2] sm:$0x1] %v14_v0 }
   0x3   :  { %16 = vsyncpa [#allocation4], 0  ;;  %s1141_s11 = smov [#allocation3]   ;;  %s1117_s15 = scalar_lea.hbm %s1504_s5, 2048 }
   0x4   :  { %s32_s12 = sshll.u32 %s1141_s11, 4  ;;  %p1118_p0 = scmp.ne.s32.totalorder %s1504_s5, %s1117_s15  ;;  %s33_s12 = int_to_ptr.vmem [resolvable:$true] %s32_s12 }
   0x5   :  { %p1121_p1 = scmp.lt.u32.totalorder %s1117_s15, %s1504_s5 }
   0x7   :  { %p1123_p2 = pnand %p1121_p1, %p1118_p0 }
   0x9   :  { %1126 = shalt.err (!%p1123_p2)
}
   0xa   :  { %s1127_s8 = scalar_lea.vmem %s33_s12, 2048  ;;  %p1132_p4 = scmp.lt.s32.totalorder %s33_s12, %s33_s12 }
   0xb   :  { %p1128_p3 = scmp.ne.s32.totalorder %s33_s12, %s1127_s8  ;;  %p1133_p5 = scmp.lt.s32.totalorder %s1127_s8, %s1127_s8 }
   0xd   :  { %p1134_p6 = por %p1133_p5, %p1132_p4 }
   0xf   :  { %p1135_p7 = pnand %p1134_p6, %p1128_p3 }
  0x11   :  { %1138 = shalt.err (!%p1135_p7)
}
  0x12   :  { %s1142_s20 = smov 128   ;;  %s1143_s21 = smov 8  }
  0x13   :  { %38 = dma.hbm_to_vmem [thread:$0]  %s1504_s5, 2048, %s33_s12, [#allocation4], %s1142_s20, %s1142_s20, %s1143_s21  }
  0x14   :  { %1139 = dma.done.wait [#allocation4], 2048  }
  0x15   :  { %1140 = vsyncadd [#allocation4], 4294965248  ;;  %v64_v1 = vld [vmem:[%s1500_s1] sm:$0xff]  ;;  %v65_v2 = vld [vmem:[%s1500_s1 + $0x8] sm:$0xff]  ;;  %vm79_vm0 = vcmask 523264   ;;  %vm735_vm1 = vcmask 7168  }
  0x16   :  { %v66_v3 = vld [vmem:[%s1500_s1 + $0x10] sm:$0xff]  ;;  %v1018_v4 = vpack.c.bf16 %v65_v2, %v64_v1  ;;  %v67_v5 = vld [vmem:[%s1500_s1 + $0x18] sm:$0xff]  ;;  %v68_v7 = vld [vmem:[%s1500_s1 + $0x20] sm:$0xff] }
  0x17   :  { %v1022_v6 = vpack.c.bf16 %v67_v5, %v66_v3  ;;  %v69_v8 = vld [vmem:[%s1500_s1 + $0x28] sm:$0xff]  ;;  %v48_v9 = vld [vmem:[%s1499_s0] sm:$0xff]  ;;  %v70_v11 = vld [vmem:[%s1500_s1 + $0x30] sm:$0xff] }
  0x18   :  { %1019 = vmatprep.subr.bf16.mxu0 %v1018_v4  ;;  %882 = vmatprep.mubr.msk.f32.mxu0 %vm79_vm0, %v48_v9  ;;  %v1026_v10 = vpack.c.bf16 %v69_v8, %v68_v7  ;;  %v71_v12 = vld [vmem:[%s1500_s1 + $0x38] sm:$0xff]  ;;  %v289_v13 = vld [vmem:[%s1502_s3] sm:$0xff]  ;;  %v290_v14 = vld [vmem:[%s1502_s3 + $0x8] sm:$0xff] }
  0x19   :  { %1021 = vmatpush3.bf16.msra.mxu0 %v1018_v4  ;;  %v291_v15 = vld [vmem:[%s1502_s3 + $0x10] sm:$0xff]  ;;  %v1030_v16 = vpack.c.bf16 %v71_v12, %v70_v11  ;;  %v1034_v17 = vpack.c.bf16 %v290_v14, %v289_v13  ;;  %v292_v18 = vld [vmem:[%s1502_s3 + $0x18] sm:$0xff]  ;;  %v293_v20 = vld [vmem:[%s1502_s3 + $0x20] sm:$0xff] }
  0x1a   :  { %1023 = vmatprep.subr.bf16.mxu0 %v1022_v6  ;;  %v1038_v19 = vpack.c.bf16 %v292_v18, %v291_v15  ;;  %v294_v21 = vld [vmem:[%s1502_s3 + $0x28] sm:$0xff]  ;;  %v295_v23 = vld [vmem:[%s1502_s3 + $0x30] sm:$0xff]  ;;  %v296_v24 = vld [vmem:[%s1502_s3 + $0x38] sm:$0xff] }
  0x1b   :  { %1035 = vmatprep.subr.bf16.mxu1 %v1034_v17  ;;  %v1042_v22 = vpack.c.bf16 %v294_v21, %v293_v20  ;;  %v49_v25 = vld [vmem:[%s1499_s0 + $0x8] sm:$0xff]  ;;  %v50_v26 = vld [vmem:[%s1499_s0 + $0x10] sm:$0xff]  ;;  %v1046_v27 = vpack.c.bf16 %v296_v24, %v295_v23  ;;  %v297_v28 = vld [vmem:[%s1502_s3 + $0x40] sm:$0xff] }
  0x1c   :  { %1037 = vmatpush3.bf16.msra.mxu1 %v1034_v17  ;;  %v298_v29 = vld [vmem:[%s1502_s3 + $0x48] sm:$0xff]  ;;  %v51_v30 = vld [vmem:[%s1499_s0 + $0x18] sm:$0xff]  ;;  %v52_v31 = vld [vmem:[%s1499_s0 + $0x20] sm:$0xff] }
  0x1d   :  { %1025 = vmatpush3.bf16.msra.mxu0 %v1022_v6  ;;  %1039 = vmatprep.subr.bf16.mxu1 %v1038_v19  ;;  %v1050_v32 = vpack.c.bf16 %v298_v29, %v297_v28  ;;  %v299_v33 = vld [vmem:[%s1502_s3 + $0x50] sm:$0xff]  ;;  %v300_v34 = vld [vmem:[%s1502_s3 + $0x58] sm:$0xff]  ;;  %v53_v35 = vld [vmem:[%s1499_s0 + $0x28] sm:$0xff] }
  0x1e   :  { %1027 = vmatprep.subr.bf16.mxu0 %v1026_v10  ;;  %v54_v36 = vld [vmem:[%s1499_s0 + $0x30] sm:$0xff]  ;;  %v1054_v37 = vpack.c.bf16 %v300_v34, %v299_v33  ;;  %v301_v38 = vld [vmem:[%s1502_s3 + $0x60] sm:$0xff]  ;;  %v302_v39 = vld [vmem:[%s1502_s3 + $0x68] sm:$0xff] }
  0x1f   :  { %v55_v40 = vld [vmem:[%s1499_s0 + $0x38] sm:$0xff]  ;;  %v56_v41 = vld [vmem:[%s1499_s0 + $0x40] sm:$0xff]  ;;  %v1058_v42 = vpack.c.bf16 %v302_v39, %v301_v38  ;;  %v57_v43 = vld [vmem:[%s1499_s0 + $0x48] sm:$0xff] }
  0x20   :  { %1041 = vmatpush3.bf16.msra.mxu1 %v1038_v19  ;;  %v58_v44 = vld [vmem:[%s1499_s0 + $0x50] sm:$0xff]  ;;  %v59_v45 = vld [vmem:[%s1499_s0 + $0x58] sm:$0xff]  ;;  %v60_v46 = vld [vmem:[%s1499_s0 + $0x60] sm:$0xff] }
  0x21   :  { %1029 = vmatpush3.bf16.msra.mxu0 %v1026_v10  ;;  %1043 = vmatprep.subr.bf16.mxu1 %v1042_v22  ;;  %v61_v47 = vld [vmem:[%s1499_s0 + $0x68] sm:$0xff]  ;;  %v62_v48 = vld [vmem:[%s1499_s0 + $0x70] sm:$0xff]  ;;  %v63_v49 = vld [vmem:[%s1499_s0 + $0x78] sm:$0xff] }
  0x22   :  { %1031 = vmatprep.subr.bf16.mxu0 %v1030_v16  ;;  %v303_v50 = vld [vmem:[%s1502_s3 + $0x70] sm:$0xff]  ;;  %v304_v51 = vld [vmem:[%s1502_s3 + $0x78] sm:$0xff]  ;;  %v473_v53 = vld [vmem:[#allocation3] sm:$0xff] }
  0x23   :  { %v1062_v52 = vpack.c.bf16 %v304_v51, %v303_v50  ;;  %v474_v54 = vld [vmem:[#allocation3 + $0x8] sm:$0xff]  ;;  %v475_v55 = vld [vmem:[#allocation3 + $0x10] sm:$0xff]  ;;  %v476_v57 = vld [vmem:[#allocation3 + $0x18] sm:$0xff] }
  0x24   :  { %1045 = vmatpush3.bf16.msra.mxu1 %v1042_v22  ;;  %v1066_v56 = vpack.c.bf16 %v474_v54, %v473_v53  ;;  %v1070_v58 = vpack.c.bf16 %v476_v57, %v475_v55  ;;  %v477_v59 = vld [vmem:[#allocation3 + $0x20] sm:$0xff]  ;;  %v478_v60 = vld [vmem:[#allocation3 + $0x28] sm:$0xff]  ;;  %v479_v62 = vld [vmem:[#allocation3 + $0x30] sm:$0xff] }
  0x25   :  { %1033 = vmatpush3.bf16.msra.mxu0 %v1030_v16  ;;  %1047 = vmatprep.subr.bf16.mxu1 %v1046_v27  ;;  %v1074_v61 = vpack.c.bf16 %v478_v60, %v477_v59  ;;  %v480_v63 = vld [vmem:[#allocation3 + $0x38] sm:$0xff]  ;;  %v481_v1 = vld [vmem:[#allocation3 + $0x40] sm:$0xff]  ;;  %v482_v2 = vld [vmem:[#allocation3 + $0x48] sm:$0xff] }
  0x26   :  { %1067 = vmatprep.subr.bf16.mxu0 %v1066_v56  ;;  %v1345_v0 = vpack.c.bf16 %v480_v63, %v479_v62  ;;  %v1348_v3 = vpack.c.bf16 %v482_v2, %v481_v1  ;;  %v483_v4 = vld [vmem:[#allocation3 + $0x50] sm:$0xff]  ;;  %v484_v5 = vld [vmem:[#allocation3 + $0x58] sm:$0xff]  ;;  %v485_v7 = vld [vmem:[#allocation3 + $0x60] sm:$0xff] }
  0x27   :  { %v1352_v6 = vpack.c.bf16 %v484_v5, %v483_v4  ;;  %v486_v8 = vld [vmem:[#allocation3 + $0x68] sm:$0xff]  ;;  %v1364_v10 = vld [vmem:[%s1501_s2] ss:$0 sm:$0xff]  ;;  %v487_v59 = vld [vmem:[#allocation3 + $0x70] sm:$0xff] }
  0x28   :  { %883 = vmatmul.mubr.msk.f32.vlgmr.msra.gmra.mrb[0].mxu0 %vm79_vm0, %v49_v25  ;;  %1049 = vmatpush3.bf16.msra.mxu1 %v1046_v27  ;;  %v1356_v9 = vpack.c.bf16 %v486_v8, %v485_v7  ;;  %v488_v60 = vld [vmem:[#allocation3 + $0x78] sm:$0xff] }
  0x29   :  { %885 = vmatprep.mubr.msk.f32.mxu0 %vm79_vm0, %v50_v26  ;;  %1051 = vmatprep.subr.bf16.mxu1 %v1050_v32  ;;  %v774_v62 = vld [vmem:[%s1503_s4] ss:$0 sm:$0xff] }
  0x2a   :  { %1069 = vmatpush3.bf16.msra.mxu0 %v1066_v56 }
  0x2b   :  { %1071 = vmatprep.subr.bf16.mxu0 %v1070_v58 }
  0x2c   :  { %886 = vmatmul.mubr.msk.f32.gmra.mrb[2].mxu0 %vm79_vm0, %v51_v30  ;;  %1053 = vmatpush3.bf16.msra.mxu1 %v1050_v32 }
  0x2d   :  { %888 = vmatprep.mubr.msk.f32.mxu0 %vm79_vm0, %v52_v31  ;;  %1055 = vmatprep.subr.bf16.mxu1 %v1054_v37 }
  0x2e   :  { %1073 = vmatpush3.bf16.msra.mxu0 %v1070_v58 }
  0x2f   :  { %1075 = vmatprep.subr.bf16.mxu0 %v1074_v61 }
  0x30   :  { %889 = vmatmul.mubr.msk.f32.gmra.mrb[4].mxu0 %vm79_vm0, %v53_v35  ;;  %1057 = vmatpush3.bf16.msra.mxu1 %v1054_v37 }
  0x31   :  { %891 = vmatprep.mubr.msk.f32.mxu0 %vm79_vm0, %v54_v36  ;;  %1059 = vmatprep.subr.bf16.mxu1 %v1058_v42 }
  0x32   :  { %1077 = vmatpush3.bf16.msra.mxu0 %v1074_v61 }
  0x33   :  { %1079 = vmatprep.subr.bf16.mxu0 %v1345_v0 }
  0x34   :  { %892 = vmatmul.mubr.msk.f32.gmra.mrb[6].mxu0 %vm79_vm0, %v55_v40  ;;  %1061 = vmatpush3.bf16.msra.mxu1 %v1058_v42 }
  0x35   :  { %894 = vmatprep.mubr.msk.f32.mxu0 %vm79_vm0, %v56_v41  ;;  %1063 = vmatprep.subr.bf16.mxu1 %v1062_v52 }
  0x36   :  { %1081 = vmatpush3.bf16.msra.mxu0 %v1345_v0 }
  0x37   :  { %1083 = vmatprep.subr.bf16.mxu0 %v1348_v3 }
  0x38   :  { %895 = vmatmul.mubr.msk.f32.gmra.mrb[8].mxu0 %vm79_vm0, %v57_v43  ;;  %1065 = vmatpush3.bf16.msra.mxu1 %v1062_v52 }
  0x39   :  { %897 = vmatprep.mubr.msk.f32.mxu0 %vm79_vm0, %v58_v44  ;;  %1098 = vmatprep.subr.bf16.mxu1 %v1066_v56 }
  0x3a   :  { %1085 = vmatpush3.bf16.msra.mxu0 %v1348_v3 }
  0x3b   :  { %1087 = vmatprep.subr.bf16.mxu0 %v1352_v6 }
  0x3c   :  { %898 = vmatmul.mubr.msk.f32.gmra.mrb[10].mxu0 %vm79_vm0, %v59_v45 }
  0x3d   :  { %900 = vmatprep.mubr.msk.f32.mxu0 %vm79_vm0, %v60_v46 }
  0x3e   :  { %1089 = vmatpush3.bf16.msra.mxu0 %v1352_v6 }
  0x3f   :  { %1091 = vmatprep.subr.bf16.mxu0 %v1356_v9 }
  0x40   :  { %901 = vmatmul.mubr.msk.f32.gmra.mrb[12].mxu0 %vm79_vm0, %v61_v47 }
  0x41   :  { %903 = vmatprep.mubr.msk.f32.mxu0 %vm79_vm0, %v62_v48 }
  0x42   :  { %1093 = vmatpush3.bf16.msra.mxu0 %v1356_v9 }
  0x44   :  { %904 = vmatmul.mubr.msk.f32.gmra.mrb[14].mxu0 %vm79_vm0, %v63_v49 }
  0xfb   :  { %v884_v11 = vpop.f32.mrb[0].mxu0 }
  0xfc   :  { %v200_v12 = vadd.f32 %v884_v11, %v1364_v10  ;;  %v194_v13 = vpop.f32.mrb[1].mxu0 }
  0xfd   :  { %v195_v14 = vadd.f32 %v1364_v10, %v194_v13 }
  0xfe   :  { %v274_v17 = vmax.f32 %v200_v12, 0.0 }
  0xff   :  { %v887_v15 = vpop.f32.mrb[2].mxu0  ;;  %v273_v16 = vmax.f32 %v195_v14, 0.0 }
 0x100   :  { %v210_v18 = vadd.f32 %v887_v15, %v1364_v10  ;;  %v204_v19 = vpop.f32.mrb[3].mxu0 }
 0x101   :  { %v205_v20 = vadd.f32 %v1364_v10, %v204_v19  ;;  %938 = vmatprep.mubr.f32.mxu1 %v273_v16 }
 0x102   :  { %939 = vmatmul.mubr.f32.vlgmr.msra.gmra.mrb[0].mxu1 %v274_v17  ;;  %v276_v23 = vmax.f32 %v210_v18, 0.0 }
 0x103   :  { %v275_v21 = vmax.f32 %v205_v20, 0.0  ;;  %v890_v22 = vpop.f32.mrb[4].mxu0  ;;  %1106 = vmatpush3.bf16.msra.mxu1 %v1066_v56 }
 0x104   :  { %v220_v24 = vadd.f32 %v890_v22, %v1364_v10  ;;  %v214_v25 = vpop.f32.mrb[5].mxu0  ;;  %1099 = vmatprep.subr.bf16.mxu1 %v1070_v58 }
 0x105   :  { %v215_v26 = vadd.f32 %v1364_v10, %v214_v25  ;;  %941 = vmatprep.mubr.f32.mxu1 %v275_v21 }
 0x106   :  { %v278_v27 = vmax.f32 %v220_v24, 0.0  ;;  %942 = vmatmul.mubr.f32.gmra.mrb[2].mxu1 %v276_v23 }
 0x107   :  { %v277_v28 = vmax.f32 %v215_v26, 0.0  ;;  %v893_v29 = vpop.f32.mrb[6].mxu0  ;;  %1107 = vmatpush3.bf16.msra.mxu1 %v1070_v58 }
 0x108   :  { %v230_v30 = vadd.f32 %v893_v29, %v1364_v10  ;;  %v224_v31 = vpop.f32.mrb[7].mxu0  ;;  %1100 = vmatprep.subr.bf16.mxu1 %v1074_v61 }
 0x109   :  { %v225_v32 = vadd.f32 %v1364_v10, %v224_v31  ;;  %944 = vmatprep.mubr.f32.mxu1 %v277_v28 }
 0x10a   :  { %v280_v33 = vmax.f32 %v230_v30, 0.0  ;;  %945 = vmatmul.mubr.f32.gmra.mrb[4].mxu1 %v278_v27 }
 0x10b   :  { %v279_v34 = vmax.f32 %v225_v32, 0.0  ;;  %v896_v35 = vpop.f32.mrb[8].mxu0  ;;  %1108 = vmatpush3.bf16.msra.mxu1 %v1074_v61  ;;  %v1094_v61 = vpack.c.bf16 %v488_v60, %v487_v59 }
 0x10c   :  { %v240_v36 = vadd.f32 %v896_v35, %v1364_v10  ;;  %v234_v37 = vpop.f32.mrb[9].mxu0  ;;  %1101 = vmatprep.subr.bf16.mxu1 %v1345_v0 }
 0x10d   :  { %v235_v38 = vadd.f32 %v1364_v10, %v234_v37  ;;  %947 = vmatprep.mubr.f32.mxu1 %v279_v34  ;;  %1095 = vmatprep.subr.bf16.mxu0 %v1094_v61 }
 0x10e   :  { %v282_v39 = vmax.f32 %v240_v36, 0.0  ;;  %948 = vmatmul.mubr.f32.gmra.mrb[6].mxu1 %v280_v33  ;;  %1097 = vmatpush3.bf16.msra.mxu0 %v1094_v61 }
 0x10f   :  { %v281_v40 = vmax.f32 %v235_v38, 0.0  ;;  %v899_v41 = vpop.f32.mrb[10].mxu0  ;;  %1109 = vmatpush3.bf16.msra.mxu1 %v1345_v0 }
 0x110   :  { %v250_v42 = vadd.f32 %v899_v41, %v1364_v10  ;;  %v244_v43 = vpop.f32.mrb[11].mxu0  ;;  %1102 = vmatprep.subr.bf16.mxu1 %v1348_v3 }
 0x111   :  { %v245_v44 = vadd.f32 %v1364_v10, %v244_v43  ;;  %950 = vmatprep.mubr.f32.mxu1 %v281_v40 }
 0x112   :  { %v284_v45 = vmax.f32 %v250_v42, 0.0  ;;  %951 = vmatmul.mubr.f32.gmra.mrb[8].mxu1 %v282_v39 }
 0x113   :  { %v283_v46 = vmax.f32 %v245_v44, 0.0  ;;  %v902_v47 = vpop.f32.mrb[12].mxu0  ;;  %1110 = vmatpush3.bf16.msra.mxu1 %v1348_v3 }
 0x114   :  { %v260_v48 = vadd.f32 %v902_v47, %v1364_v10  ;;  %v254_v49 = vpop.f32.mrb[13].mxu0  ;;  %1103 = vmatprep.subr.bf16.mxu1 %v1352_v6  ;;  %v1396_v47 = vld [vmem:[%s1505_s6] ss:$0 sm:$0xff] }
 0x115   :  { %v255_v50 = vadd.f32 %v1364_v10, %v254_v49  ;;  %953 = vmatprep.mubr.f32.mxu1 %v283_v46 }
 0x116   :  { %v286_v51 = vmax.f32 %v260_v48, 0.0  ;;  %954 = vmatmul.mubr.f32.gmra.mrb[10].mxu1 %v284_v45 }
 0x117   :  { %v285_v52 = vmax.f32 %v255_v50, 0.0  ;;  %v905_v53 = vpop.f32.mrb[14].mxu0  ;;  %1111 = vmatpush3.bf16.msra.mxu1 %v1352_v6 }
 0x118   :  { %v270_v54 = vadd.f32 %v905_v53, %v1364_v10  ;;  %v264_v55 = vpop.f32.mrb[15].mxu0  ;;  %1104 = vmatprep.subr.bf16.mxu1 %v1356_v9 }
 0x119   :  { %v265_v56 = vadd.f32 %v1364_v10, %v264_v55  ;;  %956 = vmatprep.mubr.f32.mxu1 %v285_v52  ;;  %v1403_v52 = vld [vmem:[%s1506_s7] ss:$0 sm:$0xff] }
 0x11a   :  { %v288_v57 = vmax.f32 %v270_v54, 0.0  ;;  %957 = vmatmul.mubr.f32.gmra.mrb[12].mxu1 %v286_v51 }
 0x11b   :  { %v287_v58 = vmax.f32 %v265_v56, 0.0  ;;  %1112 = vmatpush3.bf16.msra.mxu1 %v1356_v9 }
 0x11c   :  { %1105 = vmatprep.subr.bf16.mxu1 %v1094_v61 }
 0x11d   :  { %959 = vmatprep.mubr.f32.mxu1 %v287_v58 }
 0x11e   :  { %960 = vmatmul.mubr.f32.gmra.mrb[14].mxu1 %v288_v57 }
 0x11f   :  { %1113 = vmatpush3.bf16.msra.mxu1 %v1094_v61 }
 0x1d5   :  { %v940_v63 = vpop.f32.mrb[0].mxu1 }
 0x1d6   :  { %v384_v0 = vadd.f32 %v940_v63, %v774_v62  ;;  %v378_v1 = vpop.f32.mrb[1].mxu1 }
 0x1d7   :  { %v379_v2 = vadd.f32 %v774_v62, %v378_v1 }
 0x1d8   :  { %v458_v5 = vmax.f32 %v384_v0, 0.0 }
 0x1d9   :  { %v457_v3 = vmax.f32 %v379_v2, 0.0  ;;  %v943_v4 = vpop.f32.mrb[2].mxu1 }
 0x1da   :  { %v394_v6 = vadd.f32 %v943_v4, %v774_v62  ;;  %v388_v7 = vpop.f32.mrb[3].mxu1 }
 0x1db   :  { %v389_v8 = vadd.f32 %v774_v62, %v388_v7  ;;  %994 = vmatprep.mubr.f32.mxu0 %v457_v3 }
 0x1dc   :  { %995 = vmatmul.mubr.f32.vlgmr.msra.gmra.mrb[16].mxu0 %v458_v5  ;;  %v460_v11 = vmax.f32 %v394_v6, 0.0 }
 0x1dd   :  { %v459_v9 = vmax.f32 %v389_v8, 0.0  ;;  %v946_v10 = vpop.f32.mrb[4].mxu1 }
 0x1de   :  { %v404_v12 = vadd.f32 %v946_v10, %v774_v62  ;;  %v398_v13 = vpop.f32.mrb[5].mxu1 }
 0x1df   :  { %v399_v14 = vadd.f32 %v774_v62, %v398_v13  ;;  %997 = vmatprep.mubr.f32.mxu0 %v459_v9 }
 0x1e0   :  { %v462_v15 = vmax.f32 %v404_v12, 0.0  ;;  %998 = vmatmul.mubr.f32.gmra.mrb[18].mxu0 %v460_v11 }
 0x1e1   :  { %v461_v16 = vmax.f32 %v399_v14, 0.0  ;;  %v949_v17 = vpop.f32.mrb[6].mxu1 }
 0x1e2   :  { %v414_v18 = vadd.f32 %v949_v17, %v774_v62  ;;  %v408_v19 = vpop.f32.mrb[7].mxu1 }
 0x1e3   :  { %v409_v20 = vadd.f32 %v774_v62, %v408_v19  ;;  %1000 = vmatprep.mubr.f32.mxu0 %v461_v16 }
 0x1e4   :  { %v464_v21 = vmax.f32 %v414_v18, 0.0  ;;  %1001 = vmatmul.mubr.f32.gmra.mrb[20].mxu0 %v462_v15 }
 0x1e5   :  { %v463_v22 = vmax.f32 %v409_v20, 0.0  ;;  %v952_v23 = vpop.f32.mrb[8].mxu1 }
 0x1e6   :  { %v424_v24 = vadd.f32 %v952_v23, %v774_v62  ;;  %v418_v25 = vpop.f32.mrb[9].mxu1 }
 0x1e7   :  { %v419_v26 = vadd.f32 %v774_v62, %v418_v25  ;;  %1003 = vmatprep.mubr.f32.mxu0 %v463_v22 }
 0x1e8   :  { %v466_v27 = vmax.f32 %v424_v24, 0.0  ;;  %1004 = vmatmul.mubr.f32.gmra.mrb[22].mxu0 %v464_v21 }
 0x1e9   :  { %v465_v28 = vmax.f32 %v419_v26, 0.0  ;;  %v955_v29 = vpop.f32.mrb[10].mxu1 }
 0x1ea   :  { %v434_v30 = vadd.f32 %v955_v29, %v774_v62  ;;  %v428_v31 = vpop.f32.mrb[11].mxu1 }
 0x1eb   :  { %v429_v32 = vadd.f32 %v774_v62, %v428_v31  ;;  %1006 = vmatprep.mubr.f32.mxu0 %v465_v28 }
 0x1ec   :  { %v468_v33 = vmax.f32 %v434_v30, 0.0  ;;  %1007 = vmatmul.mubr.f32.gmra.mrb[24].mxu0 %v466_v27 }
 0x1ed   :  { %v467_v34 = vmax.f32 %v429_v32, 0.0  ;;  %v958_v35 = vpop.f32.mrb[12].mxu1 }
 0x1ee   :  { %v444_v36 = vadd.f32 %v958_v35, %v774_v62  ;;  %v438_v37 = vpop.f32.mrb[13].mxu1 }
 0x1ef   :  { %v439_v38 = vadd.f32 %v774_v62, %v438_v37  ;;  %1009 = vmatprep.mubr.f32.mxu0 %v467_v34 }
 0x1f0   :  { %v470_v39 = vmax.f32 %v444_v36, 0.0  ;;  %1010 = vmatmul.mubr.f32.gmra.mrb[26].mxu0 %v468_v33 }
 0x1f1   :  { %v469_v40 = vmax.f32 %v439_v38, 0.0  ;;  %v961_v41 = vpop.f32.mrb[14].mxu1 }
 0x1f2   :  { %v454_v42 = vadd.f32 %v961_v41, %v774_v62  ;;  %v448_v43 = vpop.f32.mrb[15].mxu1 }
 0x1f3   :  { %v449_v44 = vadd.f32 %v774_v62, %v448_v43  ;;  %1012 = vmatprep.mubr.f32.mxu1 %v469_v40 }
 0x1f4   :  { %v472_v45 = vmax.f32 %v454_v42, 0.0  ;;  %1013 = vmatmul.mubr.f32.vlgmr.msra.gmra.mrb[16].mxu1 %v470_v39 }
 0x1f5   :  { %v471_v46 = vmax.f32 %v449_v44, 0.0 }
 0x1f7   :  { %1015 = vmatprep.mubr.f32.mxu1 %v471_v46 }
 0x1f8   :  { %1016 = vmatmul.mubr.f32.gmra.mrb[18].mxu1 %v472_v45 }
 0x2af   :  { %v996_v48 = vpop.f32.mrb[16].mxu0 }
 0x2b0   :  { %v568_v49 = vadd.f32 %v996_v48, %v1396_v47  ;;  %v562_v50 = vpop.f32.mrb[17].mxu0 }
 0x2b1   :  { %v563_v51 = vadd.f32 %v1396_v47, %v562_v50  ;;  %v777_v50 = vld [vmem:[#allocation2] ss:$0 sm:$0xff] }
 0x2b2   :  { %v642_v53 = vmax.f32 %v568_v49, 0.0 }
 0x2b3   :  { %v999_v54 = vpop.f32.mrb[18].mxu0  ;;  %v641_v55 = vmax.f32 %v563_v51, 0.0 }
 0x2b4   :  { %v578_v56 = vadd.f32 %v999_v54, %v1396_v47  ;;  %v572_v57 = vpop.f32.mrb[19].mxu0  ;;  %v665_v58 = vmul.f32 %v1403_v52, %v642_v53 }
 0x2b5   :  { %v573_v59 = vadd.f32 %v1396_v47, %v572_v57  ;;  %v664_v2 = vmul.f32 %v1403_v52, %v641_v55 }
 0x2b6   :  { %v644_v60 = vmax.f32 %v578_v56, 0.0  ;;  %682 = vadd.xlane.f32.xlu0 %v665_v58 }
 0x2b7   :  { %v1002_v61 = vpop.f32.mrb[20].mxu0  ;;  %v643_v62 = vmax.f32 %v573_v59, 0.0 }
 0x2b8   :  { %v588_v63 = vadd.f32 %v1002_v61, %v1396_v47  ;;  %v582_v0 = vpop.f32.mrb[21].mxu0  ;;  %v667_v1 = vmul.f32 %v1403_v52, %v644_v60 }
 0x2b9   :  { %v583_v3 = vadd.f32 %v1396_v47, %v582_v0  ;;  %v666_v9 = vmul.f32 %v1403_v52, %v643_v62 }
 0x2ba   :  { %686 = vadd.xlane.f32.xlu1 %v667_v1  ;;  %680 = vadd.xlane.f32.xlu0 %v664_v2  ;;  %v646_v6 = vmax.f32 %v588_v63, 0.0 }
 0x2bb   :  { %v645_v4 = vmax.f32 %v583_v3, 0.0  ;;  %v1005_v5 = vpop.f32.mrb[22].mxu0 }
 0x2bc   :  { %v598_v7 = vadd.f32 %v1005_v5, %v1396_v47  ;;  %v592_v8 = vpop.f32.mrb[23].mxu0  ;;  %v669_v17 = vmul.f32 %v1403_v52, %v646_v6 }
 0x2bd   :  { %v593_v10 = vadd.f32 %v1396_v47, %v592_v8  ;;  %v668_v11 = vmul.f32 %v1403_v52, %v645_v4 }
 0x2be   :  { %684 = vadd.xlane.f32.xlu1 %v666_v9  ;;  %v648_v14 = vmax.f32 %v598_v7, 0.0 }
 0x2bf   :  { %v647_v12 = vmax.f32 %v593_v10, 0.0  ;;  %v1008_v13 = vpop.f32.mrb[24].mxu0  ;;  %688 = vadd.xlane.f32.xlu0 %v668_v11 }
 0x2c0   :  { %v608_v15 = vadd.f32 %v1008_v13, %v1396_v47  ;;  %v602_v16 = vpop.f32.mrb[25].mxu0  ;;  %v671_v25 = vmul.f32 %v1403_v52, %v648_v14 }
 0x2c1   :  { %v603_v18 = vadd.f32 %v1396_v47, %v602_v16  ;;  %v670_v19 = vmul.f32 %v1403_v52, %v647_v12 }
 0x2c2   :  { %690 = vadd.xlane.f32.xlu1 %v669_v17  ;;  %v650_v22 = vmax.f32 %v608_v15, 0.0 }
 0x2c3   :  { %v649_v20 = vmax.f32 %v603_v18, 0.0  ;;  %v1011_v21 = vpop.f32.mrb[26].mxu0  ;;  %692 = vadd.xlane.f32.xlu0 %v670_v19 }
 0x2c4   :  { %v618_v23 = vadd.f32 %v1011_v21, %v1396_v47  ;;  %v612_v24 = vpop.f32.mrb[27].mxu0  ;;  %v673_v33 = vmul.f32 %v1403_v52, %v650_v22 }
 0x2c5   :  { %v613_v26 = vadd.f32 %v1396_v47, %v612_v24  ;;  %v672_v27 = vmul.f32 %v1403_v52, %v649_v20 }
 0x2c6   :  { %694 = vadd.xlane.f32.xlu1 %v671_v25  ;;  %v652_v30 = vmax.f32 %v618_v23, 0.0 }
 0x2c7   :  { %v651_v28 = vmax.f32 %v613_v26, 0.0  ;;  %v1014_v29 = vpop.f32.mrb[16].mxu1  ;;  %696 = vadd.xlane.f32.xlu0 %v672_v27 }
 0x2c8   :  { %v628_v31 = vadd.f32 %v1014_v29, %v1396_v47  ;;  %v622_v32 = vpop.f32.mrb[17].mxu1  ;;  %v675_v41 = vmul.f32 %v1403_v52, %v652_v30 }
 0x2c9   :  { %v623_v34 = vadd.f32 %v1396_v47, %v622_v32  ;;  %v674_v35 = vmul.f32 %v1403_v52, %v651_v28 }
 0x2ca   :  { %698 = vadd.xlane.f32.xlu1 %v673_v33  ;;  %v654_v38 = vmax.f32 %v628_v31, 0.0 }
 0x2cb   :  { %v653_v36 = vmax.f32 %v623_v34, 0.0  ;;  %v1017_v37 = vpop.f32.mrb[18].mxu1  ;;  %700 = vadd.xlane.f32.xlu0 %v674_v35 }
 0x2cc   :  { %v638_v39 = vadd.f32 %v1017_v37, %v1396_v47  ;;  %v632_v40 = vpop.f32.mrb[19].mxu1  ;;  %v677_v46 = vmul.f32 %v1403_v52, %v654_v38 }
 0x2cd   :  { %v633_v42 = vadd.f32 %v1396_v47, %v632_v40  ;;  %v676_v43 = vmul.f32 %v1403_v52, %v653_v36 }
 0x2ce   :  { %702 = vadd.xlane.f32.xlu1 %v675_v41  ;;  %v656_v45 = vmax.f32 %v638_v39, 0.0 }
 0x2cf   :  { %v655_v44 = vmax.f32 %v633_v42, 0.0  ;;  %704 = vadd.xlane.f32.xlu0 %v676_v43 }
 0x2d0   :  { %v679_v49 = vmul.f32 %v1403_v52, %v656_v45 }
 0x2d1   :  { %v678_v48 = vmul.f32 %v1403_v52, %v655_v44 }
 0x2d2   :  { %706 = vadd.xlane.f32.xlu1 %v677_v46 }
 0x2d3   :  { %708 = vadd.xlane.f32.xlu0 %v678_v48 }
 0x2d6   :  { %710 = vadd.xlane.f32.xlu1 %v679_v49 }
 0x343   :  { %v683_v51 = vpop.xlane.xlu0 %682 }
 0x344   :  { %v720_v53 = vadd.f32 %v777_v50, %v683_v51 }
 0x346   :  { %737 = vst.msk [vmem:[%s1508_s9 + $0x8] sm:$0xff] %vm735_vm1, %v720_v53 }
 0x347   :  { %v687_v47 = vpop.xlane.xlu1 %686  ;;  %v681_v54 = vpop.xlane.xlu0 %680 }
 0x348   :  { %v722_v55 = vadd.f32 %v777_v50, %v687_v47  ;;  %v719_v56 = vadd.f32 %v777_v50, %v681_v54 }
 0x34a   :  { %739 = vst.msk [vmem:[%s1508_s9 + $0x18] sm:$0xff] %vm735_vm1, %v722_v55  ;;  %736 = vst.msk [vmem:[%s1508_s9] sm:$0xff] %vm735_vm1, %v719_v56 }
 0x34b   :  { %v685_v52 = vpop.xlane.xlu1 %684 }
 0x34c   :  { %v721_v57 = vadd.f32 %v777_v50, %v685_v52  ;;  %v689_v58 = vpop.xlane.xlu0 %688 }
 0x34d   :  { %v723_v59 = vadd.f32 %v777_v50, %v689_v58 }
 0x34e   :  { %738 = vst.msk [vmem:[%s1508_s9 + $0x10] sm:$0xff] %vm735_vm1, %v721_v57 }
 0x34f   :  { %740 = vst.msk [vmem:[%s1508_s9 + $0x20] sm:$0xff] %vm735_vm1, %v723_v59  ;;  %v691_v60 = vpop.xlane.xlu1 %690 }
 0x350   :  { %v724_v61 = vadd.f32 %v777_v50, %v691_v60  ;;  %v693_v62 = vpop.xlane.xlu0 %692 }
 0x351   :  { %v725_v63 = vadd.f32 %v777_v50, %v693_v62 }
 0x352   :  { %741 = vst.msk [vmem:[%s1508_s9 + $0x28] sm:$0xff] %vm735_vm1, %v724_v61 }
 0x353   :  { %742 = vst.msk [vmem:[%s1508_s9 + $0x30] sm:$0xff] %vm735_vm1, %v725_v63  ;;  %v695_v0 = vpop.xlane.xlu1 %694 }
 0x354   :  { %v726_v1 = vadd.f32 %v777_v50, %v695_v0  ;;  %v697_v2 = vpop.xlane.xlu0 %696 }
 0x355   :  { %v727_v3 = vadd.f32 %v777_v50, %v697_v2 }
 0x356   :  { %743 = vst.msk [vmem:[%s1508_s9 + $0x38] sm:$0xff] %vm735_vm1, %v726_v1 }
 0x357   :  { %744 = vst.msk [vmem:[%s1508_s9 + $0x40] sm:$0xff] %vm735_vm1, %v727_v3  ;;  %v699_v4 = vpop.xlane.xlu1 %698 }
 0x358   :  { %v728_v5 = vadd.f32 %v777_v50, %v699_v4  ;;  %v701_v6 = vpop.xlane.xlu0 %700 }
 0x359   :  { %v729_v7 = vadd.f32 %v777_v50, %v701_v6 }
 0x35a   :  { %745 = vst.msk [vmem:[%s1508_s9 + $0x48] sm:$0xff] %vm735_vm1, %v728_v5 }
 0x35b   :  { %746 = vst.msk [vmem:[%s1508_s9 + $0x50] sm:$0xff] %vm735_vm1, %v729_v7  ;;  %v703_v8 = vpop.xlane.xlu1 %702 }
 0x35c   :  { %v730_v9 = vadd.f32 %v777_v50, %v703_v8  ;;  %v705_v10 = vpop.xlane.xlu0 %704 }
 0x35d   :  { %v731_v11 = vadd.f32 %v777_v50, %v705_v10 }
 0x35e   :  { %747 = vst.msk [vmem:[%s1508_s9 + $0x58] sm:$0xff] %vm735_vm1, %v730_v9 }
 0x35f   :  { %748 = vst.msk [vmem:[%s1508_s9 + $0x60] sm:$0xff] %vm735_vm1, %v731_v11  ;;  %v707_v12 = vpop.xlane.xlu1 %706 }
 0x360   :  { %v732_v13 = vadd.f32 %v777_v50, %v707_v12  ;;  %v709_v14 = vpop.xlane.xlu0 %708 }
 0x361   :  { %v733_v15 = vadd.f32 %v777_v50, %v709_v14 }
 0x362   :  { %749 = vst.msk [vmem:[%s1508_s9 + $0x68] sm:$0xff] %vm735_vm1, %v732_v13 }
 0x363   :  { %750 = vst.msk [vmem:[%s1508_s9 + $0x70] sm:$0xff] %vm735_vm1, %v733_v15  ;;  %v711_v16 = vpop.xlane.xlu1 %710 }
 0x364   :  { %v734_v17 = vadd.f32 %v777_v50, %v711_v16 }
 0x366   :  { %751 = vst.msk [vmem:[%s1508_s9 + $0x78] sm:$0xff] %vm735_vm1, %v734_v17 }
 0x367   :  { %756 = vsyncpa [#allocation4], 1 }

</bundles_post_ra>
